<compile_context>
chip_gen: v6e
topology: v6e:2x2x1
jax: 0.10.0
libtpu: 0.0.40
codegen_flags: <defaults>
</compile_context>

<pallas_src>
import jax
import jax.numpy as jnp
from jax.experimental import pallas as pl
from jax.experimental.pallas import tpu as pltpu


def transition_kernel(x_ref, scale_ref, shift_ref, w_ref, o_ref):
    # x_ref:     (4, tile, Cin)   bf16 -- the four 2x2 pool phases of this tile
    # scale_ref: (1, Cin)         f32  -- 0.25 * gamma / sqrt(var + eps)
    # shift_ref: (1, Cin)         f32  -- 0.25 * (beta - mean * scale)
    # w_ref:     (Cin, Cout_pad)  bf16 -- 1x1 conv weight, lane-dense padded Cout
    # o_ref:     (tile, Cout_pad) bf16
    scale = scale_ref[...]
    shift = shift_ref[...]
    # BN affine + ReLU in f32 on the VPU (v5e has no bf16 VPU; mem-bound so the
    # upconvert is free). Pool factor is pre-folded into scale/shift, so the
    # 2x2 average pool reduces to summing the four phases.
    pooled = jnp.maximum(x_ref[0].astype(jnp.float32) * scale + shift, 0.0)
    for p in range(1, 4):
        pooled = pooled + jnp.maximum(
            x_ref[p].astype(jnp.float32) * scale + shift, 0.0)
    # 1x1 conv == channel matmul: bf16 operands, f32 accumulation on the MXU.
    z = jnp.dot(pooled.astype(jnp.bfloat16), w_ref[...],
                preferred_element_type=jnp.float32)
    o_ref[...] = z.astype(o_ref.dtype)


def _round_up(x, m):
    return ((x + m - 1) // m) * m


def _vmem_capacity_bytes():
    try:
        info = pltpu.get_tpu_info()
        cap = getattr(info, "vmem_capacity_bytes", None)
        if cap:
            return int(cap)
    except Exception:
        pass
    return 64 << 20  # conservative fallback: v7x per-TensorCore VMEM


def _pick_tile(rows, cin, cout_pad, budget_bytes):
    """Largest row tile (multiple of 8) whose live VMEM fits budget_bytes."""
    fixed = 2 * cin * cout_pad * 2 + 4 * cin * 4        # weight (x2, bf16) + scale/shift
    per_row = (2 * 4 * cin * 2      # x phases: double-buffered bf16
               + 2 * cout_pad * 2   # output:   double-buffered bf16
               + 2 * cin * 4)       # ~two f32 (tile, Cin) compute temporaries
    t = (budget_bytes - fixed) // per_row
    t = min(int(t), 4096, _round_up(rows, 8))
    return max(8, (t // 8) * 8)


def transition_forward(x_nchw, gamma, beta, conv_w, eps=1e-5):
    """x_nchw: (N, Cin, H, W) f32; conv_w: (Cout, Cin, 1, 1) PyTorch layout.
    Returns (N, Cout, H//2, W//2) f32, matching Transition.forward (train-mode BN)."""
    N, Cin, H, W = x_nchw.shape
    Cout = conv_w.shape[0]
    assert H % 2 == 0 and W % 2 == 0, "AvgPool2d(2,2) expects even H, W"
    Hp, Wp = H // 2, W // 2
    HWp = Hp * Wp
    rows = N * HWp

    # --- layout: NCHW -> (4 pool phases, N*Hp*Wp, Cin), staged bf16 -----------
    # phase p = 2*dh + dw, row index r = n*Hp*Wp + hp*Wp + wp
    x_ph = (x_nchw.reshape(N, Cin, Hp, 2, Wp, 2)
                  .transpose(3, 5, 0, 2, 4, 1)          # (dh, dw, N, Hp, Wp, Cin)
                  .reshape(4, rows, Cin)
                  .astype(jnp.bfloat16))

    # --- BatchNorm2d batch stats (training mode), f32 accumulation ------------
    cnt = 4.0 * rows                                    # == N*H*W
    s1 = jnp.sum(x_ph, axis=(0, 1), dtype=jnp.float32)
    s2 = jnp.sum(jnp.square(x_ph.astype(jnp.float32)), axis=(0, 1))
    mean = s1 / cnt
    var = jnp.maximum(s2 / cnt - mean * mean, 0.0)      # biased var (PyTorch norm)
    scale = gamma / jnp.sqrt(var + eps)
    shift = beta - mean * scale
    # relu(0.25*a) == 0.25*relu(a): fold the 2x2 avg-pool factor into BN affine.
    scale_k = (0.25 * scale).reshape(1, Cin).astype(jnp.float32)
    shift_k = (0.25 * shift).reshape(1, Cin).astype(jnp.float32)

    # --- 1x1 conv weight: (Cout, Cin, 1, 1) -> bf16 (Cin, Cout_pad), lane-dense
    Cout_pad = _round_up(Cout, 128)
    w = jnp.transpose(conv_w[:, :, 0, 0], (1, 0))                 # (Cin, Cout)
    w = jnp.pad(w, ((0, 0), (0, Cout_pad - Cout))).astype(jnp.bfloat16)

    # --- VMEM-aware tiling over the flattened batch*spatial row axis ----------
    cap = _vmem_capacity_bytes()
    tile = _pick_tile(rows, Cin, Cout_pad, budget_bytes=int(cap * 0.4))
    rows_pad = _round_up(rows, tile)
    if rows_pad != rows:
        x_ph = jnp.pad(x_ph, ((0, 0), (0, rows_pad - rows), (0, 0)))
    grid = (rows_pad // tile,)

    vmem_need = (2 * 4 * tile * Cin * 2 + 2 * tile * Cout_pad * 2
                 + 2 * Cin * Cout_pad * 2 + 2 * tile * Cin * 4 + (2 << 20))
    vmem_limit = int(min(cap * 0.9, max(vmem_need, 32 << 20)))

    out_flat = pl.pallas_call(
        transition_kernel,
        out_shape=jax.ShapeDtypeStruct((rows_pad, Cout_pad), jnp.bfloat16),
        grid_spec=pltpu.PrefetchScalarGridSpec(
            num_scalar_prefetch=0,
            grid=grid,
            in_specs=[
                pl.BlockSpec((4, tile, Cin), lambda t: (0, t, 0)),
                pl.BlockSpec((1, Cin), lambda t: (0, 0)),
                pl.BlockSpec((1, Cin), lambda t: (0, 0)),
                pl.BlockSpec((Cin, Cout_pad), lambda t: (0, 0)),
            ],
            out_specs=pl.BlockSpec((tile, Cout_pad), lambda t: (t, 0)),
        ),
        compiler_params=pltpu.CompilerParams(
            dimension_semantics=("parallel",),
            vmem_limit_bytes=vmem_limit),
    )(x_ph, scale_k, shift_k, w)

    # TODO(synk): in a fused DenseNet pipeline the next stage should consume the
    # (rows, Cout) bf16 NHWC-style layout directly; we only transpose back to
    # NCHW f32 here to match the PyTorch Transition.forward contract.
    out = out_flat[:rows, :Cout].reshape(N, Hp, Wp, Cout)
    return jnp.transpose(out, (0, 3, 1, 2)).astype(jnp.float32)


def transition_reference(x_nchw, gamma, beta, conv_w, eps=1e-5):
    """Pure-JAX (f32) reference matching the PyTorch Transition.forward."""
    mean = jnp.mean(x_nchw, axis=(0, 2, 3), keepdims=True)
    var = jnp.mean((x_nchw - mean) ** 2, axis=(0, 2, 3), keepdims=True)
    y = (x_nchw - mean) / jnp.sqrt(var + eps)
    y = y * gamma[None, :, None, None] + beta[None, :, None, None]
    y = jnp.maximum(y, 0.0)
    z = jnp.einsum('nchw,oc->nohw', y, conv_w[:, :, 0, 0])
    N, Co, H, W = z.shape
    return z.reshape(N, Co, H // 2, 2, W // 2, 2).mean(axis=(3, 5))


if __name__ == "__main__":
    key = jax.random.PRNGKey(0)
    k1, k2, k3, k4 = jax.random.split(key, 4)

    N, Cin, Cout, H, W = 2, 4, 2, 16, 16

    x = jax.random.normal(k1, (N, Cin, H, W), jnp.float32)
    gamma = 1.0 + 0.1 * jax.random.normal(k2, (Cin,), jnp.float32)   # BN weight
    beta = 0.1 * jax.random.normal(k3, (Cin,), jnp.float32)          # BN bias
    conv_w = 0.5 * jax.random.normal(k4, (Cout, Cin, 1, 1), jnp.float32)

    out = transition_forward(x, gamma, beta, conv_w)
    out = jax.block_until_ready(out)

    ref = transition_reference(x, gamma, beta, conv_w)
    assert out.shape == (N, Cout, H // 2, W // 2), out.shape
    # Input staging, matmul operands and kernel output are bf16 (f32 accum /
    # f32 stats), so tolerance is relaxed vs the pure-f32 reference.
    assert jnp.allclose(out, ref, atol=7e-2, rtol=7e-2), \
        float(jnp.max(jnp.abs(out - ref)))

    print("KERNEL_OK")
</pallas_src>

<mosaic_0001>
module attributes {stable_mosaic.version = 11 : i64} {
  func.func @transition_kernel(%arg0: i32, %arg1: memref<4x128x4xbf16, #tpu.memory_space<vmem>>, %arg2: memref<1x4xf32, #tpu.memory_space<vmem>>, %arg3: memref<1x4xf32, #tpu.memory_space<vmem>>, %arg4: memref<4x128xbf16, #tpu.memory_space<vmem>>, %arg5: memref<128x128xbf16, #tpu.memory_space<vmem>>) attributes {dimension_semantics = [#tpu.dimension_semantics<parallel>], iteration_bounds = array<i64: 1>, scalar_prefetch = 0 : i64, scratch_operands = 0 : i64, tpu.core_type = #tpu.core_type<tc>, window_params = [{transform_indices = @transform_0, window_bounds = array<i64: 4, 128, 4>}, {pipeline_mode = #tpu.pipeline_mode<synchronous>, transform_indices = @transform_1, window_bounds = array<i64: 1, 4>}, {pipeline_mode = #tpu.pipeline_mode<synchronous>, transform_indices = @transform_2, window_bounds = array<i64: 1, 4>}, {pipeline_mode = #tpu.pipeline_mode<synchronous>, transform_indices = @transform_3, window_bounds = array<i64: 4, 128>}, {transform_indices = @transform_4, window_bounds = array<i64: 128, 128>}]} {
    %c0 = arith.constant 0 : index
    %c0_0 = arith.constant 0 : index
    %0 = vector.load %arg2[%c0, %c0_0] : memref<1x4xf32, #tpu.memory_space<vmem>>, vector<1x4xf32>
    %c0_1 = arith.constant 0 : index
    %c0_2 = arith.constant 0 : index
    %1 = vector.load %arg3[%c0_1, %c0_2] : memref<1x4xf32, #tpu.memory_space<vmem>>, vector<1x4xf32>
    %c0_3 = arith.constant 0 : index
    %c0_4 = arith.constant 0 : index
    %c0_5 = arith.constant 0 : index
    %2 = vector.load %arg1[%c0_3, %c0_4, %c0_5] : memref<4x128x4xbf16, #tpu.memory_space<vmem>>, vector<1x128x4xbf16>
    %3 = vector.shape_cast %2 : vector<1x128x4xbf16> to vector<128x4xbf16>
    %4 = arith.extf %3 : vector<128x4xbf16> to vector<128x4xf32>
    %5 = vector.broadcast %0 : vector<1x4xf32> to vector<128x4xf32>
    %6 = arith.mulf %4, %5 : vector<128x4xf32>
    %7 = vector.broadcast %1 : vector<1x4xf32> to vector<128x4xf32>
    %8 = arith.addf %6, %7 : vector<128x4xf32>
    %cst = arith.constant 0.000000e+00 : f32
    %9 = vector.broadcast %cst : f32 to vector<128x4xf32>
    %10 = arith.maximumf %8, %9 : vector<128x4xf32>
    %c1 = arith.constant 1 : index
    %c0_6 = arith.constant 0 : index
    %c0_7 = arith.constant 0 : index
    %11 = vector.load %arg1[%c1, %c0_6, %c0_7] : memref<4x128x4xbf16, #tpu.memory_space<vmem>>, vector<1x128x4xbf16>
    %12 = vector.shape_cast %11 : vector<1x128x4xbf16> to vector<128x4xbf16>
    %13 = arith.extf %12 : vector<128x4xbf16> to vector<128x4xf32>
    %14 = vector.broadcast %0 : vector<1x4xf32> to vector<128x4xf32>
    %15 = arith.mulf %13, %14 : vector<128x4xf32>
    %16 = vector.broadcast %1 : vector<1x4xf32> to vector<128x4xf32>
    %17 = arith.addf %15, %16 : vector<128x4xf32>
    %cst_8 = arith.constant 0.000000e+00 : f32
    %18 = vector.broadcast %cst_8 : f32 to vector<128x4xf32>
    %19 = arith.maximumf %17, %18 : vector<128x4xf32>
    %20 = arith.addf %10, %19 : vector<128x4xf32>
    %c2 = arith.constant 2 : index
    %c0_9 = arith.constant 0 : index
    %c0_10 = arith.constant 0 : index
    %21 = vector.load %arg1[%c2, %c0_9, %c0_10] : memref<4x128x4xbf16, #tpu.memory_space<vmem>>, vector<1x128x4xbf16>
    %22 = vector.shape_cast %21 : vector<1x128x4xbf16> to vector<128x4xbf16>
    %23 = arith.extf %22 : vector<128x4xbf16> to vector<128x4xf32>
    %24 = vector.broadcast %0 : vector<1x4xf32> to vector<128x4xf32>
    %25 = arith.mulf %23, %24 : vector<128x4xf32>
    %26 = vector.broadcast %1 : vector<1x4xf32> to vector<128x4xf32>
    %27 = arith.addf %25, %26 : vector<128x4xf32>
    %cst_11 = arith.constant 0.000000e+00 : f32
    %28 = vector.broadcast %cst_11 : f32 to vector<128x4xf32>
    %29 = arith.maximumf %27, %28 : vector<128x4xf32>
    %30 = arith.addf %20, %29 : vector<128x4xf32>
    %c3 = arith.constant 3 : index
    %c0_12 = arith.constant 0 : index
    %c0_13 = arith.constant 0 : index
    %31 = vector.load %arg1[%c3, %c0_12, %c0_13] : memref<4x128x4xbf16, #tpu.memory_space<vmem>>, vector<1x128x4xbf16>
    %32 = vector.shape_cast %31 : vector<1x128x4xbf16> to vector<128x4xbf16>
    %33 = arith.extf %32 : vector<128x4xbf16> to vector<128x4xf32>
    %34 = vector.broadcast %0 : vector<1x4xf32> to vector<128x4xf32>
    %35 = arith.mulf %33, %34 : vector<128x4xf32>
    %36 = vector.broadcast %1 : vector<1x4xf32> to vector<128x4xf32>
    %37 = arith.addf %35, %36 : vector<128x4xf32>
    %cst_14 = arith.constant 0.000000e+00 : f32
    %38 = vector.broadcast %cst_14 : f32 to vector<128x4xf32>
    %39 = arith.maximumf %37, %38 : vector<128x4xf32>
    %40 = arith.addf %30, %39 : vector<128x4xf32>
    %41 = arith.truncf %40 : vector<128x4xf32> to vector<128x4xbf16>
    %c0_15 = arith.constant 0 : index
    %c0_16 = arith.constant 0 : index
    %42 = vector.load %arg4[%c0_15, %c0_16] : memref<4x128xbf16, #tpu.memory_space<vmem>>, vector<4x128xbf16>
    %cst_17 = arith.constant dense<0.000000e+00> : vector<128x128xf32>
    %43 = tpu.matmul %41, %42, %cst_17 {dimension_numbers = #tpu.dot_dimension_numbers<[1], [0], [0], [1], [0, 0, 1, 1], [], []>} : vector<128x4xbf16>, vector<4x128xbf16>, vector<128x128xf32> -> vector<128x128xf32>
    %44 = arith.truncf %43 : vector<128x128xf32> to vector<128x128xbf16>
    %c0_18 = arith.constant 0 : index
    %c0_19 = arith.constant 0 : index
    %45 = vector.load %arg5[%c0_18, %c0_19] : memref<128x128xbf16, #tpu.memory_space<vmem>>, vector<128x128xbf16>
    tpu.vector_store %arg5[%c0_18, %c0_19], %44 {strides = array<i32>} : memref<128x128xbf16, #tpu.memory_space<vmem>>, vector<128x128xbf16>,
    return
  }
  func.func @transform_0(%arg0: i32) -> (i32, i32, i32) {
    %c0_i32 = arith.constant 0 : i32
    %c0_i32_0 = arith.constant 0 : i32
    %c0_i32_1 = arith.constant 0 : i32
    return %c0_i32, %arg0, %c0_i32_0 : i32, i32, i32
  }
  func.func @transform_1(%arg0: i32) -> (i32, i32) {
    %c0_i32 = arith.constant 0 : i32
    %c0_i32_0 = arith.constant 0 : i32
    %c0_i32_1 = arith.constant 0 : i32
    return %c0_i32, %c0_i32_0 : i32, i32
  }
  func.func @transform_2(%arg0: i32) -> (i32, i32) {
    %c0_i32 = arith.constant 0 : i32
    %c0_i32_0 = arith.constant 0 : i32
    %c0_i32_1 = arith.constant 0 : i32
    return %c0_i32, %c0_i32_0 : i32, i32
  }
  func.func @transform_3(%arg0: i32) -> (i32, i32) {
    %c0_i32 = arith.constant 0 : i32
    %c0_i32_0 = arith.constant 0 : i32
    %c0_i32_1 = arith.constant 0 : i32
    return %c0_i32, %c0_i32_0 : i32, i32
  }
  func.func @transform_4(%arg0: i32) -> (i32, i32) {
    %c0_i32 = arith.constant 0 : i32
    %c0_i32_0 = arith.constant 0 : i32
    return %arg0, %c0_i32 : i32, i32
  }
}

</mosaic_0001>

<bundles_post_ra>
// kernel: tpu_custom_call.1
= control target key start
LH: loop header
LB: loop body
LE: loop exit
PB: predicated region body
PF: predicated region fallthrough
CT: control target
= control target key end

     0   :  { %vm438_vm0 = vcmask 1041408   ;;  %vm413_vm1 = vcmask 31744   ;;  %s1263_s0 = inlined_call_operand.vmem [shape: bf16[4,128,4], index: 0, kind: input, shape index: {}]   ;;  %s1264_s1 = inlined_call_operand.vmem [shape: f32[1,4], index: 1, kind: input, shape index: {}]   ;;  %s1265_s2 = inlined_call_operand.vmem [shape: f32[1,4], index: 2, kind: input, shape index: {}]   ;;  %s1266_s3 = inlined_call_operand.vmem [shape: bf16[4,128], index: 3, kind: input, shape index: {}]   ;;  %s1267_s4 = inlined_call_operand.hbm [shape: bf16[128,128], index: 4, kind: output, shape index: {}]  }
   0x1   :  { %v412_v0 = vld [vmem:[%s1266_s3] sm:$0x3] }
   0x2   :  { %v1021_v1 = vld [vmem:[%s1264_s1] ss:$0 sm:$0xff]  ;;  %960 = vmatprep.subr.msk.bf16.mxu0 %vm438_vm0, %v412_v0  ;;  %961 = vmatprep.subr.msk.bf16.mxu1 %vm438_vm0, %v412_v0  ;;  %v440_v3 = vsel %vm438_vm0, %v412_v0, 0 }
   0x3   :  { %v726_v2 = vld [vmem:[%s1263_s0] sm:$0xff]   ;;  %941 = vmatpush3.bf16.msra.mxu0 %v440_v3  ;;  %959 = vmatpush3.bf16.msra.mxu1 %v440_v3 }
   0x4   :  { %v727_v4 = vunpack.c.l.bf16 %v726_v2  ;;  %v728_v5 = vunpack.c.h.bf16 %v726_v2  ;;  %v900_v6 = vld [vmem:[%s1263_s0 + $0x40] sm:$0xff]  }
   0x5   :  { %v908_v7 = vld [vmem:[%s1263_s0 + $0x80] sm:$0xff]   ;;  %v759_v9 = vunpack.c.l.bf16 %v900_v6  ;;  %v760_v10 = vunpack.c.h.bf16 %v900_v6 }
   0x6   :  { %v1035_v8 = vld [vmem:[%s1265_s2] ss:$0 sm:$0xff]  ;;  %v791_v11 = vunpack.c.l.bf16 %v908_v7  ;;  %v792_v12 = vunpack.c.h.bf16 %v908_v7  ;;  %v59_v14 = vmul.f32 %v727_v4, %v1021_v1  ;;  %v60_v15 = vmul.f32 %v728_v5, %v1021_v1 }
   0x7   :  { %v916_v13 = vld [vmem:[%s1263_s0 + $0xc0] sm:$0xff]   ;;  %v146_v18 = vmul.f32 %v759_v9, %v1021_v1  ;;  %v147_v19 = vmul.f32 %v760_v10, %v1021_v1 }
   0x8   :  { %v823_v16 = vunpack.c.l.bf16 %v916_v13  ;;  %v824_v17 = vunpack.c.h.bf16 %v916_v13  ;;  %v243_v20 = vmul.f32 %v791_v11, %v1021_v1  ;;  %v244_v21 = vmul.f32 %v792_v12, %v1021_v1  ;;  %v896_v30 = vld [vmem:[%s1263_s0 + $0x20] sm:$0xff]  }
   0x9   :  { %v81_v22 = vadd.f32 %v1035_v8, %v59_v14  ;;  %v82_v23 = vadd.f32 %v1035_v8, %v60_v15  ;;  %v162_v26 = vadd.f32 %v1035_v8, %v146_v18  ;;  %v163_v27 = vadd.f32 %v1035_v8, %v147_v19  ;;  %v904_v35 = vld [vmem:[%s1263_s0 + $0x60] sm:$0xff]  }
   0xa   :  { %v340_v24 = vmul.f32 %v823_v16, %v1021_v1  ;;  %v341_v25 = vmul.f32 %v824_v17, %v1021_v1  ;;  %v259_v28 = vadd.f32 %v1035_v8, %v243_v20  ;;  %v260_v29 = vadd.f32 %v1035_v8, %v244_v21  ;;  %v912_v40 = vld [vmem:[%s1263_s0 + $0xa0] sm:$0xff]  }
   0xb   :  { %v97_v31 = vmax.f32 %v81_v22, 0.0  ;;  %v98_v32 = vmax.f32 %v82_v23, 0.0  ;;  %v178_v36 = vmax.f32 %v162_v26, 0.0  ;;  %v179_v37 = vmax.f32 %v163_v27, 0.0 }
   0xc   :  { %v356_v33 = vadd.f32 %v1035_v8, %v340_v24  ;;  %v357_v34 = vadd.f32 %v1035_v8, %v341_v25  ;;  %v275_v38 = vmax.f32 %v259_v28, 0.0  ;;  %v276_v39 = vmax.f32 %v260_v29, 0.0 }
   0xd   :  { %v743_v43 = vunpack.c.l.bf16 %v896_v30  ;;  %v744_v44 = vunpack.c.h.bf16 %v896_v30  ;;  %v194_v45 = vadd.f32 %v178_v36, %v97_v31  ;;  %v195_v46 = vadd.f32 %v179_v37, %v98_v32 }
   0xe   :  { %v372_v41 = vmax.f32 %v356_v33, 0.0  ;;  %v373_v42 = vmax.f32 %v357_v34, 0.0  ;;  %v775_v47 = vunpack.c.l.bf16 %v904_v35  ;;  %v776_v48 = vunpack.c.h.bf16 %v904_v35 }
   0xf   :  { %v67_v49 = vmul.f32 %v743_v43, %v1021_v1  ;;  %v68_v50 = vmul.f32 %v744_v44, %v1021_v1  ;;  %v807_v51 = vunpack.c.l.bf16 %v912_v40  ;;  %v808_v52 = vunpack.c.h.bf16 %v912_v40 }
  0x10   :  { %v291_v53 = vadd.f32 %v275_v38, %v194_v45  ;;  %v292_v54 = vadd.f32 %v276_v39, %v195_v46  ;;  %v154_v55 = vmul.f32 %v775_v47, %v1021_v1  ;;  %v155_v56 = vmul.f32 %v776_v48, %v1021_v1 }
  0x11   :  { %9 = vsyncpa [#allocation3], 0  ;;  %v89_v57 = vadd.f32 %v1035_v8, %v67_v49  ;;  %v90_v58 = vadd.f32 %v1035_v8, %v68_v50  ;;  %v251_v59 = vmul.f32 %v807_v51, %v1021_v1  ;;  %v252_v60 = vmul.f32 %v808_v52, %v1021_v1  ;;  %v920_v61 = vld [vmem:[%s1263_s0 + $0xe0] sm:$0xff]   ;;  %v893_v3 = vld [vmem:[%s1263_s0 + $0x8] sm:$0xff]  }
  0x12   :  { %v388_v62 = vadd.f32 %v372_v41, %v291_v53  ;;  %v389_v63 = vadd.f32 %v373_v42, %v292_v54  ;;  %v170_v0 = vadd.f32 %v1035_v8, %v154_v55  ;;  %v171_v2 = vadd.f32 %v1035_v8, %v155_v56  ;;  %v901_v13 = vld [vmem:[%s1263_s0 + $0x48] sm:$0xff]  }
  0x13   :  { %v105_v4 = vmax.f32 %v89_v57, 0.0  ;;  %v106_v5 = vmax.f32 %v90_v58, 0.0  ;;  %v267_v6 = vadd.f32 %v1035_v8, %v251_v59  ;;  %v268_v7 = vadd.f32 %v1035_v8, %v252_v60  ;;  %v909_v26 = vld [vmem:[%s1263_s0 + $0x88] sm:$0xff]  }
  0x14   :  { %v404_v9 = vpack.c.bf16 %v389_v63, %v388_v62  ;;  %v186_v10 = vmax.f32 %v170_v0, 0.0  ;;  %v187_v11 = vmax.f32 %v171_v2, 0.0  ;;  %v839_v12 = vunpack.c.l.bf16 %v920_v61  ;;  %v917_v39 = vld [vmem:[%s1263_s0 + $0xc8] sm:$0xff]  }
  0x15   :  { %v283_v14 = vmax.f32 %v267_v6, 0.0  ;;  %v284_v15 = vmax.f32 %v268_v7, 0.0  ;;  %v840_v16 = vunpack.c.h.bf16 %v920_v61  ;;  %v731_v17 = vunpack.c.l.bf16 %v893_v3  ;;  %v897_v44 = vld [vmem:[%s1263_s0 + $0x28] sm:$0xff]  }
  0x16   :  { %942 = vmatprep.mubr.msk.bf16.mxu0 %vm413_vm1, %v404_v9  ;;  %v202_v18 = vadd.f32 %v186_v10, %v105_v4  ;;  %v203_v19 = vadd.f32 %v187_v11, %v106_v5  ;;  %v348_v20 = vmul.f32 %v839_v12, %v1021_v1  ;;  %v732_v21 = vunpack.c.h.bf16 %v893_v3  ;;  %v905_v57 = vld [vmem:[%s1263_s0 + $0x68] sm:$0xff]  }
  0x17   :  { %v349_v22 = vmul.f32 %v840_v16, %v1021_v1  ;;  %v61_v23 = vmul.f32 %v731_v17, %v1021_v1  ;;  %v763_v24 = vunpack.c.l.bf16 %v901_v13  ;;  %v764_v25 = vunpack.c.h.bf16 %v901_v13  ;;  %v913_v7 = vld [vmem:[%s1263_s0 + $0xa8] sm:$0xff]  }
  0x18   :  { %v299_v27 = vadd.f32 %v283_v14, %v202_v18  ;;  %v300_v28 = vadd.f32 %v284_v15, %v203_v19  ;;  %v364_v29 = vadd.f32 %v1035_v8, %v348_v20  ;;  %v62_v30 = vmul.f32 %v732_v21, %v1021_v1  ;;  %v921_v21 = vld [vmem:[%s1263_s0 + $0xe8] sm:$0xff]  }
  0x19   :  { %v365_v31 = vadd.f32 %v1035_v8, %v349_v22  ;;  %v83_v32 = vadd.f32 %v1035_v8, %v61_v23  ;;  %v148_v33 = vmul.f32 %v763_v24, %v1021_v1  ;;  %v149_v34 = vmul.f32 %v764_v25, %v1021_v1 }
  0x1a   :  { %v380_v35 = vmax.f32 %v364_v29, 0.0  ;;  %v84_v36 = vadd.f32 %v1035_v8, %v62_v30  ;;  %v795_v37 = vunpack.c.l.bf16 %v909_v26  ;;  %v796_v38 = vunpack.c.h.bf16 %v909_v26  ;;  %v894_v26 = vld [vmem:[%s1263_s0 + $0x10] sm:$0xff]  }
  0x1b   :  { %v381_v40 = vmax.f32 %v365_v31, 0.0  ;;  %v99_v41 = vmax.f32 %v83_v32, 0.0  ;;  %v164_v42 = vadd.f32 %v1035_v8, %v148_v33  ;;  %v165_v43 = vadd.f32 %v1035_v8, %v149_v34 }
  0x1c   :  { %v396_v45 = vadd.f32 %v380_v35, %v299_v27  ;;  %v100_v46 = vmax.f32 %v84_v36, 0.0  ;;  %v245_v47 = vmul.f32 %v795_v37, %v1021_v1  ;;  %v246_v48 = vmul.f32 %v796_v38, %v1021_v1 }
  0x1d   :  { %v397_v49 = vadd.f32 %v381_v40, %v300_v28  ;;  %v180_v50 = vmax.f32 %v164_v42, 0.0  ;;  %v181_v51 = vmax.f32 %v165_v43, 0.0  ;;  %v827_v52 = vunpack.c.l.bf16 %v917_v39 }
  0x1e   :  { %v261_v53 = vadd.f32 %v1035_v8, %v245_v47  ;;  %v262_v54 = vadd.f32 %v1035_v8, %v246_v48  ;;  %v828_v55 = vunpack.c.h.bf16 %v917_v39  ;;  %v747_v56 = vunpack.c.l.bf16 %v897_v44  ;;  %v902_v39 = vld [vmem:[%s1263_s0 + $0x50] sm:$0xff]  }
  0x1f   :  { %v408_v58 = vpack.c.bf16 %v397_v49, %v396_v45  ;;  %v196_v59 = vadd.f32 %v180_v50, %v99_v41  ;;  %v197_v60 = vadd.f32 %v181_v51, %v100_v46  ;;  %v342_v61 = vmul.f32 %v827_v52, %v1021_v1  ;;  %v910_v52 = vld [vmem:[%s1263_s0 + $0x90] sm:$0xff]  }
  0x20   :  { %v277_v62 = vmax.f32 %v261_v53, 0.0  ;;  %v278_v63 = vmax.f32 %v262_v54, 0.0  ;;  %v343_v0 = vmul.f32 %v828_v55, %v1021_v1  ;;  %v748_v2 = vunpack.c.h.bf16 %v897_v44 }
  0x21   :  { %950 = vmatprep.mubr.msk.bf16.mxu1 %vm413_vm1, %v408_v58  ;;  %v358_v3 = vadd.f32 %v1035_v8, %v342_v61  ;;  %v69_v4 = vmul.f32 %v747_v56, %v1021_v1  ;;  %v779_v5 = vunpack.c.l.bf16 %v905_v57  ;;  %v780_v6 = vunpack.c.h.bf16 %v905_v57  ;;  %v918_v61 = vld [vmem:[%s1263_s0 + $0xd0] sm:$0xff]  }
  0x22   :  { %v293_v9 = vadd.f32 %v277_v62, %v196_v59  ;;  %v294_v10 = vadd.f32 %v278_v63, %v197_v60  ;;  %v359_v11 = vadd.f32 %v1035_v8, %v343_v0  ;;  %v70_v12 = vmul.f32 %v748_v2, %v1021_v1 }
  0x23   :  { %v374_v13 = vmax.f32 %v358_v3, 0.0  ;;  %v91_v14 = vadd.f32 %v1035_v8, %v69_v4  ;;  %v156_v15 = vmul.f32 %v779_v5, %v1021_v1  ;;  %v157_v16 = vmul.f32 %v780_v6, %v1021_v1 }
  0x24   :  { %v375_v17 = vmax.f32 %v359_v11, 0.0  ;;  %v92_v18 = vadd.f32 %v1035_v8, %v70_v12  ;;  %v811_v19 = vunpack.c.l.bf16 %v913_v7  ;;  %v812_v20 = vunpack.c.h.bf16 %v913_v7  ;;  %v898_v7 = vld [vmem:[%s1263_s0 + $0x30] sm:$0xff]  }
  0x25   :  { %v390_v22 = vadd.f32 %v374_v13, %v293_v9  ;;  %v107_v23 = vmax.f32 %v91_v14, 0.0  ;;  %v172_v24 = vadd.f32 %v1035_v8, %v156_v15  ;;  %v173_v25 = vadd.f32 %v1035_v8, %v157_v16 }
  0x26   :  { %v391_v27 = vadd.f32 %v375_v17, %v294_v10  ;;  %v108_v28 = vmax.f32 %v92_v18, 0.0  ;;  %v253_v29 = vmul.f32 %v811_v19, %v1021_v1  ;;  %v254_v30 = vmul.f32 %v812_v20, %v1021_v1 }
  0x27   :  { %v188_v31 = vmax.f32 %v172_v24, 0.0  ;;  %v189_v32 = vmax.f32 %v173_v25, 0.0  ;;  %v843_v33 = vunpack.c.l.bf16 %v921_v21  ;;  %v844_v34 = vunpack.c.h.bf16 %v921_v21  ;;  %v906_v21 = vld [vmem:[%s1263_s0 + $0x70] sm:$0xff]  }
  0x28   :  { %v405_v35 = vpack.c.bf16 %v391_v27, %v390_v22  ;;  %v269_v36 = vadd.f32 %v1035_v8, %v253_v29  ;;  %v270_v37 = vadd.f32 %v1035_v8, %v254_v30  ;;  %v735_v38 = vunpack.c.l.bf16 %v894_v26 }
  0x29   :  { %v204_v40 = vadd.f32 %v188_v31, %v107_v23  ;;  %v205_v41 = vadd.f32 %v189_v32, %v108_v28  ;;  %v350_v42 = vmul.f32 %v843_v33, %v1021_v1  ;;  %v351_v43 = vmul.f32 %v844_v34, %v1021_v1  ;;  %v914_v34 = vld [vmem:[%s1263_s0 + $0xb0] sm:$0xff]  }
  0x2a   :  { %943 = vmatmul.mubr.msk.bf16.vlgmr.msra.gmra.mxu0 %vm413_vm1, %v405_v35  ;;  %v285_v44 = vmax.f32 %v269_v36, 0.0  ;;  %v286_v45 = vmax.f32 %v270_v37, 0.0  ;;  %v736_v46 = vunpack.c.h.bf16 %v894_v26  ;;  %v63_v47 = vmul.f32 %v735_v38, %v1021_v1 }
  0x2b   :  { %v366_v48 = vadd.f32 %v1035_v8, %v350_v42  ;;  %v367_v49 = vadd.f32 %v1035_v8, %v351_v43  ;;  %v767_v50 = vunpack.c.l.bf16 %v902_v39  ;;  %v768_v51 = vunpack.c.h.bf16 %v902_v39  ;;  %v922_v43 = vld [vmem:[%s1263_s0 + $0xf0] sm:$0xff]  }
  0x2c   :  { %v301_v53 = vadd.f32 %v285_v44, %v204_v40  ;;  %v302_v54 = vadd.f32 %v286_v45, %v205_v41  ;;  %v64_v55 = vmul.f32 %v736_v46, %v1021_v1  ;;  %v85_v56 = vadd.f32 %v1035_v8, %v63_v47 }
  0x2d   :  { %v382_v57 = vmax.f32 %v366_v48, 0.0  ;;  %v383_v58 = vmax.f32 %v367_v49, 0.0  ;;  %v150_v59 = vmul.f32 %v767_v50, %v1021_v1  ;;  %v151_v60 = vmul.f32 %v768_v51, %v1021_v1  ;;  %v895_v48 = vld [vmem:[%s1263_s0 + $0x18] sm:$0xff]  }
  0x2e   :  { %v86_v62 = vadd.f32 %v1035_v8, %v64_v55  ;;  %v101_v63 = vmax.f32 %v85_v56, 0.0  ;;  %v799_v0 = vunpack.c.l.bf16 %v910_v52  ;;  %v800_v2 = vunpack.c.h.bf16 %v910_v52 }
  0x2f   :  { %v398_v3 = vadd.f32 %v382_v57, %v301_v53  ;;  %v399_v4 = vadd.f32 %v383_v58, %v302_v54  ;;  %v166_v5 = vadd.f32 %v1035_v8, %v150_v59  ;;  %v167_v6 = vadd.f32 %v1035_v8, %v151_v60 }
  0x30   :  { %v102_v9 = vmax.f32 %v86_v62, 0.0  ;;  %v247_v10 = vmul.f32 %v799_v0, %v1021_v1  ;;  %v248_v11 = vmul.f32 %v800_v2, %v1021_v1  ;;  %v831_v12 = vunpack.c.l.bf16 %v918_v61  ;;  %v903_v2 = vld [vmem:[%s1263_s0 + $0x58] sm:$0xff]  }
  0x31   :  { %v409_v13 = vpack.c.bf16 %v399_v4, %v398_v3  ;;  %v182_v14 = vmax.f32 %v166_v5, 0.0  ;;  %v183_v15 = vmax.f32 %v167_v6, 0.0  ;;  %v832_v16 = vunpack.c.h.bf16 %v918_v61 }
  0x32   :  { %v263_v17 = vadd.f32 %v1035_v8, %v247_v10  ;;  %v264_v18 = vadd.f32 %v1035_v8, %v248_v11  ;;  %v344_v19 = vmul.f32 %v831_v12, %v1021_v1  ;;  %v751_v20 = vunpack.c.l.bf16 %v898_v7 }
  0x33   :  { %951 = vmatmul.mubr.msk.bf16.vlgmr.msra.gmra.mxu1 %vm413_vm1, %v409_v13  ;;  %v198_v22 = vadd.f32 %v182_v14, %v101_v63  ;;  %v199_v23 = vadd.f32 %v183_v15, %v102_v9  ;;  %v345_v24 = vmul.f32 %v832_v16, %v1021_v1  ;;  %v752_v25 = vunpack.c.h.bf16 %v898_v7  ;;  %v911_v16 = vld [vmem:[%s1263_s0 + $0x98] sm:$0xff]  }
  0x34   :  { %v279_v26 = vmax.f32 %v263_v17, 0.0  ;;  %v280_v27 = vmax.f32 %v264_v18, 0.0  ;;  %v360_v28 = vadd.f32 %v1035_v8, %v344_v19  ;;  %v71_v29 = vmul.f32 %v751_v20, %v1021_v1 }
  0x35   :  { %v361_v30 = vadd.f32 %v1035_v8, %v345_v24  ;;  %v72_v31 = vmul.f32 %v752_v25, %v1021_v1  ;;  %v783_v32 = vunpack.c.l.bf16 %v906_v21  ;;  %v784_v33 = vunpack.c.h.bf16 %v906_v21  ;;  %v919_v21 = vld [vmem:[%s1263_s0 + $0xd8] sm:$0xff]  }
  0x36   :  { %v295_v35 = vadd.f32 %v279_v26, %v198_v22  ;;  %v296_v36 = vadd.f32 %v280_v27, %v199_v23  ;;  %v376_v37 = vmax.f32 %v360_v28, 0.0  ;;  %v93_v38 = vadd.f32 %v1035_v8, %v71_v29 }
  0x37   :  { %v377_v39 = vmax.f32 %v361_v30, 0.0  ;;  %v94_v40 = vadd.f32 %v1035_v8, %v72_v31  ;;  %v158_v41 = vmul.f32 %v783_v32, %v1021_v1  ;;  %v159_v42 = vmul.f32 %v784_v33, %v1021_v1  ;;  %v899_v30 = vld [vmem:[%s1263_s0 + $0x38] sm:$0xff]  }
  0x38   :  { %v392_v44 = vadd.f32 %v376_v37, %v295_v35  ;;  %v109_v45 = vmax.f32 %v93_v38, 0.0  ;;  %v815_v46 = vunpack.c.l.bf16 %v914_v34  ;;  %v816_v47 = vunpack.c.h.bf16 %v914_v34 }
  0x39   :  { %v393_v49 = vadd.f32 %v377_v39, %v296_v36  ;;  %v110_v50 = vmax.f32 %v94_v40, 0.0  ;;  %v174_v51 = vadd.f32 %v1035_v8, %v158_v41  ;;  %v175_v52 = vadd.f32 %v1035_v8, %v159_v42 }
  0x3a   :  { %v255_v53 = vmul.f32 %v815_v46, %v1021_v1  ;;  %v256_v54 = vmul.f32 %v816_v47, %v1021_v1  ;;  %v847_v55 = vunpack.c.l.bf16 %v922_v43  ;;  %v848_v56 = vunpack.c.h.bf16 %v922_v43  ;;  %v907_v47 = vld [vmem:[%s1263_s0 + $0x78] sm:$0xff]  }
  0x3b   :  { %v406_v57 = vpack.c.bf16 %v393_v49, %v392_v44  ;;  %v190_v58 = vmax.f32 %v174_v51, 0.0  ;;  %v191_v59 = vmax.f32 %v175_v52, 0.0  ;;  %v739_v60 = vunpack.c.l.bf16 %v895_v48 }
  0x3c   :  { %v271_v61 = vadd.f32 %v1035_v8, %v255_v53  ;;  %v272_v62 = vadd.f32 %v1035_v8, %v256_v54  ;;  %v352_v63 = vmul.f32 %v847_v55, %v1021_v1  ;;  %v353_v0 = vmul.f32 %v848_v56, %v1021_v1  ;;  %v915_v56 = vld [vmem:[%s1263_s0 + $0xb8] sm:$0xff]  }
  0x3d   :  { %946 = vmatprep.mubr.msk.bf16.mxu0 %vm413_vm1, %v406_v57  ;;  %v206_v3 = vadd.f32 %v190_v58, %v109_v45  ;;  %v207_v4 = vadd.f32 %v191_v59, %v110_v50  ;;  %v740_v5 = vunpack.c.h.bf16 %v895_v48  ;;  %v65_v6 = vmul.f32 %v739_v60, %v1021_v1 }
  0x3e   :  { %v287_v7 = vmax.f32 %v271_v61, 0.0  ;;  %v288_v9 = vmax.f32 %v272_v62, 0.0  ;;  %v368_v10 = vadd.f32 %v1035_v8, %v352_v63  ;;  %v369_v11 = vadd.f32 %v1035_v8, %v353_v0 }
  0x3f   :  { %v66_v12 = vmul.f32 %v740_v5, %v1021_v1  ;;  %v87_v13 = vadd.f32 %v1035_v8, %v65_v6  ;;  %v771_v14 = vunpack.c.l.bf16 %v903_v2  ;;  %v772_v15 = vunpack.c.h.bf16 %v903_v2  ;;  %v923_v2 = vld [vmem:[%s1263_s0 + $0xf8] sm:$0xff]   ;;  %s987_s0 = smov [#allocation2]  }
  0x40   :  { %v303_v17 = vadd.f32 %v287_v7, %v206_v3  ;;  %v304_v18 = vadd.f32 %v288_v9, %v207_v4  ;;  %v384_v19 = vmax.f32 %v368_v10, 0.0  ;;  %v385_v20 = vmax.f32 %v369_v11, 0.0  ;;  %s624_s25 = sshll.u32 %s987_s0, 4  ;;  %s625_s25 = int_to_ptr.vmem [resolvable:$true] %s624_s25 }
  0x41   :  { %v88_v22 = vadd.f32 %v1035_v8, %v66_v12  ;;  %v103_v23 = vmax.f32 %v87_v13, 0.0  ;;  %v152_v24 = vmul.f32 %v771_v14, %v1021_v1  ;;  %v153_v25 = vmul.f32 %v772_v15, %v1021_v1  ;;  %s965_s26 = scalar_lea.vmem %s625_s25, 1024  ;;  %p970_p1 = scmp.lt.s32.totalorder %s625_s25, %s625_s25 }
  0x42   :  { %v400_v26 = vadd.f32 %v384_v19, %v303_v17  ;;  %v401_v27 = vadd.f32 %v385_v20, %v304_v18  ;;  %v803_v28 = vunpack.c.l.bf16 %v911_v16  ;;  %v804_v29 = vunpack.c.h.bf16 %v911_v16  ;;  %p966_p0 = scmp.ne.s32.totalorder %s625_s25, %s965_s26  ;;  %p971_p2 = scmp.lt.s32.totalorder %s965_s26, %s965_s26 }
  0x43   :  { %v104_v31 = vmax.f32 %v88_v22, 0.0  ;;  %v168_v32 = vadd.f32 %v1035_v8, %v152_v24  ;;  %v169_v33 = vadd.f32 %v1035_v8, %v153_v25  ;;  %v835_v34 = vunpack.c.l.bf16 %v919_v21 }
  0x44   :  { %v410_v35 = vpack.c.bf16 %v401_v27, %v400_v26  ;;  %v249_v36 = vmul.f32 %v803_v28, %v1021_v1  ;;  %v250_v37 = vmul.f32 %v804_v29, %v1021_v1  ;;  %v836_v38 = vunpack.c.h.bf16 %v919_v21  ;;  %p972_p3 = por %p971_p2, %p970_p1 }
  0x45   :  { %v184_v39 = vmax.f32 %v168_v32, 0.0  ;;  %v185_v40 = vmax.f32 %v169_v33, 0.0  ;;  %v346_v41 = vmul.f32 %v835_v34, %v1021_v1  ;;  %v755_v42 = vunpack.c.l.bf16 %v899_v30 }
  0x46   :  { %954 = vmatprep.mubr.msk.bf16.mxu1 %vm413_vm1, %v410_v35  ;;  %v265_v43 = vadd.f32 %v1035_v8, %v249_v36  ;;  %v266_v44 = vadd.f32 %v1035_v8, %v250_v37  ;;  %v347_v45 = vmul.f32 %v836_v38, %v1021_v1  ;;  %v756_v46 = vunpack.c.h.bf16 %v899_v30  ;;  %p973_p4 = pnand %p972_p3, %p966_p0 }
  0x47   :  { %v200_v48 = vadd.f32 %v184_v39, %v103_v23  ;;  %v201_v49 = vadd.f32 %v185_v40, %v104_v31  ;;  %v362_v50 = vadd.f32 %v1035_v8, %v346_v41  ;;  %v73_v51 = vmul.f32 %v755_v42, %v1021_v1 }
  0x48   :  { %v281_v52 = vmax.f32 %v265_v43, 0.0  ;;  %v282_v53 = vmax.f32 %v266_v44, 0.0  ;;  %v363_v54 = vadd.f32 %v1035_v8, %v347_v45  ;;  %v74_v55 = vmul.f32 %v756_v46, %v1021_v1 }
  0x49   :  { %v378_v57 = vmax.f32 %v362_v50, 0.0  ;;  %v95_v58 = vadd.f32 %v1035_v8, %v73_v51  ;;  %v787_v59 = vunpack.c.l.bf16 %v907_v47  ;;  %v788_v60 = vunpack.c.h.bf16 %v907_v47 }
  0x4a   :  { %v297_v61 = vadd.f32 %v281_v52, %v200_v48  ;;  %v298_v62 = vadd.f32 %v282_v53, %v201_v49  ;;  %v379_v63 = vmax.f32 %v363_v54, 0.0  ;;  %v96_v0 = vadd.f32 %v1035_v8, %v74_v55 }
  0x4b   :  { %v111_v3 = vmax.f32 %v95_v58, 0.0  ;;  %v160_v4 = vmul.f32 %v787_v59, %v1021_v1  ;;  %v161_v5 = vmul.f32 %v788_v60, %v1021_v1  ;;  %v819_v6 = vunpack.c.l.bf16 %v915_v56 }
  0x4c   :  { %v394_v7 = vadd.f32 %v378_v57, %v297_v61  ;;  %v395_v9 = vadd.f32 %v379_v63, %v298_v62  ;;  %v112_v10 = vmax.f32 %v96_v0, 0.0  ;;  %v820_v11 = vunpack.c.h.bf16 %v915_v56 }
  0x4d   :  { %v176_v12 = vadd.f32 %v1035_v8, %v160_v4  ;;  %v177_v13 = vadd.f32 %v1035_v8, %v161_v5  ;;  %v257_v14 = vmul.f32 %v819_v6, %v1021_v1  ;;  %v851_v15 = vunpack.c.l.bf16 %v923_v2 }
  0x4e   :  { %v407_v16 = vpack.c.bf16 %v395_v9, %v394_v7  ;;  %v258_v17 = vmul.f32 %v820_v11, %v1021_v1  ;;  %v852_v18 = vunpack.c.h.bf16 %v923_v2 }
  0x4f   :  { %v192_v19 = vmax.f32 %v176_v12, 0.0  ;;  %v193_v20 = vmax.f32 %v177_v13, 0.0  ;;  %v273_v21 = vadd.f32 %v1035_v8, %v257_v14  ;;  %v354_v22 = vmul.f32 %v851_v15, %v1021_v1 }
  0x50   :  { %947 = vmatmul.mubr.msk.bf16.gmra.mxu0 %vm413_vm1, %v407_v16  ;;  %v274_v23 = vadd.f32 %v1035_v8, %v258_v17  ;;  %v355_v24 = vmul.f32 %v852_v18, %v1021_v1 }
  0x51   :  { %v208_v25 = vadd.f32 %v192_v19, %v111_v3  ;;  %v209_v26 = vadd.f32 %v193_v20, %v112_v10  ;;  %v289_v27 = vmax.f32 %v273_v21, 0.0  ;;  %v370_v28 = vadd.f32 %v1035_v8, %v354_v22 }
  0x52   :  { %v290_v29 = vmax.f32 %v274_v23, 0.0  ;;  %v371_v30 = vadd.f32 %v1035_v8, %v355_v24 }
  0x53   :  { %v305_v31 = vadd.f32 %v289_v27, %v208_v25  ;;  %v386_v32 = vmax.f32 %v370_v28, 0.0 }
  0x54   :  { %v306_v33 = vadd.f32 %v290_v29, %v209_v26  ;;  %v387_v34 = vmax.f32 %v371_v30, 0.0 }
  0x55   :  { %v402_v35 = vadd.f32 %v386_v32, %v305_v31 }
  0x56   :  { %v403_v36 = vadd.f32 %v387_v34, %v306_v33 }
  0x58   :  { %v411_v37 = vpack.c.bf16 %v403_v36, %v402_v35 }
  0x5a   :  { %955 = vmatmul.mubr.msk.bf16.gmra.mxu1 %vm413_vm1, %v411_v37 }
  0xea   :  { %v944_v38 = vpop.f32.mrf.mxu0 }
  0xec   :  { %v476_v39 = vpop.f32.mrf.mxu0 }
  0xee   :  { %v945_v1 = vpop.f32.mrf.mxu0 }
  0xef   :  { %v861_v40 = vpack.c.bf16 %v945_v1, %v944_v38 }
  0xf0   :  { %v479_v41 = vpop.f32.mrf.mxu0 }
  0xf1   :  { %924 = vst [vmem:[#allocation2 + $0x8] sm:$0xff] %v861_v40   ;;  %v856_v42 = vpack.c.bf16 %v479_v41, %v476_v39 }
  0xf3   :  { %v952_v43 = vpop.f32.mrf.mxu1  ;;  %857 = vst [vmem:[#allocation2] sm:$0xff] %v856_v42  }
  0xf5   :  { %v508_v44 = vpop.f32.mrf.mxu1 }
  0xf7   :  { %v953_v8 = vpop.f32.mrf.mxu1 }
  0xf8   :  { %v881_v45 = vpack.c.bf16 %v953_v8, %v952_v43 }
  0xf9   :  { %v511_v46 = vpop.f32.mrf.mxu1 }
  0xfa   :  { %928 = vst [vmem:[#allocation2 + $0x28] sm:$0xff] %v881_v45   ;;  %v876_v47 = vpack.c.bf16 %v511_v46, %v508_v44 }
  0xfc   :  { %927 = vst [vmem:[#allocation2 + $0x20] sm:$0xff] %v876_v47  }
 0x110   :  { %v948_v48 = vpop.f32.mrf.mxu0 }
 0x112   :  { %v492_v49 = vpop.f32.mrf.mxu0 }
 0x114   :  { %v949_v50 = vpop.f32.mrf.mxu0 }
 0x115   :  { %v871_v51 = vpack.c.bf16 %v949_v50, %v948_v48 }
 0x116   :  { %v495_v52 = vpop.f32.mrf.mxu0 }
 0x117   :  { %926 = vst [vmem:[#allocation2 + $0x18] sm:$0xff] %v871_v51   ;;  %v866_v53 = vpack.c.bf16 %v495_v52, %v492_v49 }
 0x119   :  { %925 = vst [vmem:[#allocation2 + $0x10] sm:$0xff] %v866_v53  }
 0x11a   :  { %v956_v54 = vpop.f32.mrf.mxu1 }
 0x11c   :  { %v524_v55 = vpop.f32.mrf.mxu1 }
 0x11e   :  { %v957_v56 = vpop.f32.mrf.mxu1 }
 0x11f   :  { %v891_v57 = vpack.c.bf16 %v957_v56, %v956_v54 }
 0x120   :  { %v527_v58 = vpop.f32.mrf.mxu1 }
 0x121   :  { %930 = vst [vmem:[#allocation2 + $0x38] sm:$0xff] %v891_v57   ;;  %v886_v59 = vpack.c.bf16 %v527_v58, %v524_v55 }
 0x123   :  { %929 = vst [vmem:[#allocation2 + $0x30] sm:$0xff] %v886_v59  }
 0x124   :  { %976 = shalt.err (!%p973_p4)
}
 0x125   :  { %s988_s2 = smov 64   ;;  %s989_s27 = smov 4  }
 0x126   :  { %630 = dma.vmem_to_hbm [thread:$0]  %s625_s25, 1024, %s1267_s4, [#allocation3], %s988_s2, %s988_s2, %s989_s27  }
 0x127   :  { %985 = dma.done.wait [#allocation3], 1024  }
 0x128   :  { %986 = vsyncadd [#allocation3], 4294966272 }
 0x129   :  { %634 = vsyncpa [#allocation3], 1 }

</bundles_post_ra>
